<compile_context>
chip_gen: v7x
topology: tpu7x:2x2x1
jax: 0.10.0
libtpu: 0.0.40
codegen_flags: <defaults>
</compile_context>

<pallas_src>
from functools import partial

import jax
import jax.numpy as jnp
from jax.experimental import pallas as pl
from jax.experimental.pallas import tpu as pltpu

NUM_CLASS = 100
BN_EPS = 1e-5


def _round_up(x, m):
    return ((x + m - 1) // m) * m


# --------------------------------------------------------------------------
# Pallas kernels
# --------------------------------------------------------------------------
def _matmul_bn_kernel(a_ref, b_ref, scale_ref, shift_ref, *rest, relu, has_res):
    """Full-K matmul tile with fused BN (scale/shift), optional residual, ReLU."""
    if has_res:
        id_ref, o_ref = rest
    else:
        (o_ref,) = rest
    y = jnp.dot(a_ref[...], b_ref[...], preferred_element_type=jnp.float32)
    y = y * scale_ref[...] + shift_ref[...]
    if has_res:
        y = y + id_ref[...]
    if relu:
        y = jnp.maximum(y, 0.0)
    o_ref[...] = y


def _maxpool_kernel(x_ref, o_ref):
    # x_ref: (9, tr, 128) taps; elementwise max over tap axis.
    o_ref[...] = jnp.max(x_ref[...], axis=0)


def _avgpool_kernel(x_ref, o_ref):
    # x_ref: (1, HW, C) -> (1, 1, C)
    o_ref[...] = jnp.mean(x_ref[...], axis=1, keepdims=True)


# --------------------------------------------------------------------------
# Matmul wrapper: (M,K)@(Kp,Np) with folded BN epilogue (+residual, +ReLU)
# --------------------------------------------------------------------------
def matmul_bn(a, prep, relu, identity=None):
    """a: (M, K) f32.  prep holds pre-padded bf16 weights + BN scale/shift."""
    M, K = a.shape
    Kp, Np, Ncols = prep["Kp"], prep["Np"], prep["cout"]

    if M > 256:
        tm = 256
        Mp = _round_up(M, 256)
    else:
        Mp = _round_up(M, 16)
        tm = Mp
    tn = 256 if (Np % 256 == 0) else 128

    a_bf = a.astype(jnp.bfloat16)
    if (Mp, Kp) != (M, K):
        a_bf = jnp.zeros((Mp, Kp), jnp.bfloat16).at[:M, :K].set(a_bf)

    has_res = identity is not None
    inputs = [a_bf, prep["w"], prep["scale"], prep["shift"]]
    in_specs = [
        pl.BlockSpec((tm, Kp), lambda i, j: (i, 0)),
        pl.BlockSpec((Kp, tn), lambda i, j: (0, j)),
        pl.BlockSpec((1, tn), lambda i, j: (0, j)),
        pl.BlockSpec((1, tn), lambda i, j: (0, j)),
    ]
    if has_res:
        idp = identity.astype(jnp.float32)
        if idp.shape != (Mp, Np):
            idp = jnp.zeros((Mp, Np), jnp.float32).at[:M, :Ncols].set(idp)
        inputs.append(idp)
        in_specs.append(pl.BlockSpec((tm, tn), lambda i, j: (i, j)))

    out = pl.pallas_call(
        partial(_matmul_bn_kernel, relu=relu, has_res=has_res),
        out_shape=jax.ShapeDtypeStruct((Mp, Np), jnp.float32),
        grid_spec=pltpu.PrefetchScalarGridSpec(
            num_scalar_prefetch=0,
            grid=(Mp // tm, Np // tn),
            in_specs=in_specs,
            out_specs=pl.BlockSpec((tm, tn), lambda i, j: (i, j)),
        ),
        compiler_params=pltpu.CompilerParams(
            dimension_semantics=("parallel", "parallel")),
    )(*inputs)
    return out[:M, :Ncols]


# --------------------------------------------------------------------------
# Convolution glue (1x1 bypass, im2col for 3x3 / 7x7)
# --------------------------------------------------------------------------
def im2col(x, kh, kw, stride, pad):
    # TODO(synk): 3x3/7x7 convs still materialize im2col patches in HBM;
    # implicit im2col (tap axis in the matmul grid) is not implemented.
    N, H, W, C = x.shape
    xp = jnp.pad(x, ((0, 0), (pad, pad), (pad, pad), (0, 0)))
    OH = (H + 2 * pad - kh) // stride + 1
    OW = (W + 2 * pad - kw) // stride + 1
    cols = [xp[:, i:i + stride * OH:stride, j:j + stride * OW:stride, :]
            for i in range(kh) for j in range(kw)]
    patches = jnp.concatenate(cols, axis=-1)          # (N, OH, OW, kh*kw*C)
    return patches.reshape(N * OH * OW, kh * kw * C), OH, OW


def conv_bn(x, prep, stride, pad, relu, identity=None):
    """Conv + folded BN (+ optional fused residual add + ReLU)."""
    N = x.shape[0]
    kh, kw = prep["kh"], prep["kw"]
    if kh == 1 and kw == 1:
        if stride > 1:
            x = x[:, ::stride, ::stride, :]
        OH, OW = x.shape[1], x.shape[2]
        a = x.reshape(N * OH * OW, x.shape[3])
    else:
        a, OH, OW = im2col(x, kh, kw, stride, pad)
    id2 = None
    if identity is not None:
        id2 = identity.reshape(N * OH * OW, identity.shape[-1])
    y = matmul_bn(a, prep, relu=relu, identity=id2)
    return y.reshape(N, OH, OW, prep["cout"])


# --------------------------------------------------------------------------
# Pooling wrappers
# --------------------------------------------------------------------------
def maxpool_3x3_s2(x):
    N, H, W, C = x.shape
    k, s, pad = 3, 2, 1
    OH = (H + 2 * pad - k) // s + 1
    OW = (W + 2 * pad - k) // s + 1
    xp = jnp.pad(x, ((0, 0), (pad, pad), (pad, pad), (0, 0)),
                 constant_values=-jnp.inf)
    cols = [xp[:, i:i + s * OH:s, j:j + s * OW:s, :]
            for i in range(k) for j in range(k)]
    total = N * OH * OW * C
    stacked = jnp.stack(cols, axis=0).reshape(k * k, total)

    # Lane-dense repack: view the (taps, rows*C) slab as (taps, R2, 128).
    Tp = _round_up(total, 128)
    if Tp != total:
        stacked = jnp.pad(stacked, ((0, 0), (0, Tp - total)))
    R2 = Tp // 128
    if R2 <= 512:
        tr = _round_up(R2, 8)
        R2p = tr
    else:
        tr = 512
        R2p = _round_up(R2, 512)
    stacked3 = stacked.reshape(k * k, R2, 128)
    if R2p != R2:
        stacked3 = jnp.pad(stacked3, ((0, 0), (0, R2p - R2), (0, 0)))

    out = pl.pallas_call(
        _maxpool_kernel,
        out_shape=jax.ShapeDtypeStruct((R2p, 128), jnp.float32),
        grid_spec=pltpu.PrefetchScalarGridSpec(
            num_scalar_prefetch=0,
            grid=(R2p // tr,),
            in_specs=[pl.BlockSpec((k * k, tr, 128), lambda i: (0, i, 0))],
            out_specs=pl.BlockSpec((tr, 128), lambda i: (i, 0)),
        ),
        compiler_params=pltpu.CompilerParams(dimension_semantics=("parallel",)),
    )(stacked3)
    return out.reshape(-1)[:total].reshape(N, OH, OW, C)


def global_avgpool(x):
    N, H, W, C = x.shape
    HW = H * W
    out = pl.pallas_call(
        _avgpool_kernel,
        out_shape=jax.ShapeDtypeStruct((N, 1, C), jnp.float32),
        grid_spec=pltpu.PrefetchScalarGridSpec(
            num_scalar_prefetch=0,
            grid=(N,),
            in_specs=[pl.BlockSpec((1, HW, C), lambda n: (n, 0, 0))],
            out_specs=pl.BlockSpec((1, 1, C), lambda n: (n, 0, 0)),
        ),
        compiler_params=pltpu.CompilerParams(dimension_semantics=("parallel",)),
    )(x.reshape(N, HW, C))
    return out.reshape(N, C)


# --------------------------------------------------------------------------
# Bottleneck block (residual fused into conv3 epilogue)
# --------------------------------------------------------------------------
def bottleneck(x, blk):
    if blk["downsample"] is not None:
        identity = conv_bn(x, blk["downsample"], stride=blk["stride"], pad=0,
                           relu=False)
    else:
        identity = x
    out = conv_bn(x, blk["conv1"], stride=1, pad=0, relu=True)
    out = conv_bn(out, blk["conv2"], stride=blk["stride"], pad=1, relu=True)
    # conv3: BN + residual add + ReLU fused into the matmul epilogue.
    out = conv_bn(out, blk["conv3"], stride=1, pad=0, relu=True,
                  identity=identity)
    return out


# --------------------------------------------------------------------------
# Parameter construction + one-time inference prep (BN fold, pad, bf16 cast)
# --------------------------------------------------------------------------
def make_resnet50_params(key, num_class=NUM_CLASS):
    # TODO(synk): pretrained torchvision weights cannot be loaded in-script;
    # deterministic He-init random weights are used instead.
    keys = list(jax.random.split(key, 64))
    idx = [0]

    def nk():
        k = keys[idx[0]]
        idx[0] += 1
        return k

    def conv_w(kh, kw, cin, cout):
        fan_in = kh * kw * cin
        return jax.random.normal(nk(), (kh, kw, cin, cout),
                                 jnp.float32) * (2.0 / fan_in) ** 0.5

    def bn_p(c):
        # inference-mode BN params (running stats)
        return dict(gamma=jnp.ones((c,), jnp.float32),
                    beta=jnp.zeros((c,), jnp.float32),
                    mean=jnp.zeros((c,), jnp.float32),
                    var=jnp.ones((c,), jnp.float32))

    params = {"conv1": conv_w(7, 7, 3, 64), "bn1": bn_p(64)}

    stage_cfg = [(3, 64, 1), (4, 128, 2), (6, 256, 2), (3, 512, 2)]
    in_ch = 64
    stages = []
    for n_blocks, width, stride in stage_cfg:
        blocks = []
        for b in range(n_blocks):
            s = stride if b == 0 else 1
            out_ch = width * 4
            blk = {
                "conv1": conv_w(1, 1, in_ch, width), "bn1": bn_p(width),
                "conv2": conv_w(3, 3, width, width), "bn2": bn_p(width),
                "conv3": conv_w(1, 1, width, out_ch), "bn3": bn_p(out_ch),
                "stride": s,
                "downsample": None,
            }
            if s != 1 or in_ch != out_ch:
                blk["downsample"] = (conv_w(1, 1, in_ch, out_ch), bn_p(out_ch))
            blocks.append(blk)
            in_ch = out_ch
        stages.append(blocks)
    params["layers"] = stages

    fc_in = 2048
    params["fc_w"] = jax.random.normal(nk(), (fc_in, num_class),
                                       jnp.float32) * (1.0 / fc_in) ** 0.5
    params["fc_b"] = jax.random.normal(nk(), (num_class,),
                                       jnp.float32) * 0.01
    return params


def bn_fold(bn):
    scale = bn["gamma"] / jnp.sqrt(bn["var"] + BN_EPS)
    shift = bn["beta"] - bn["mean"] * scale
    return scale, shift


def _prep_conv(w_hwio, bn):
    kh, kw, cin, cout = w_hwio.shape
    K = kh * kw * cin
    Kp = _round_up(K, 16)
    Np = _round_up(cout, 128)
    wmat = w_hwio.reshape(K, cout).astype(jnp.bfloat16)
    w_p = jnp.zeros((Kp, Np), jnp.bfloat16).at[:K, :cout].set(wmat)
    scale, shift = bn_fold(bn)
    scale_p = jnp.zeros((1, Np), jnp.float32).at[0, :cout].set(scale)
    shift_p = jnp.zeros((1, Np), jnp.float32).at[0, :cout].set(shift)
    return dict(kh=kh, kw=kw, cout=cout, K=K, Kp=Kp, Np=Np,
                w=w_p, scale=scale_p, shift=shift_p)


def _prep_fc(w, b):
    K, cout = w.shape
    Kp = _round_up(K, 16)
    Np = _round_up(cout, 128)
    w_p = jnp.zeros((Kp, Np), jnp.bfloat16).at[:K, :cout].set(
        w.astype(jnp.bfloat16))
    scale_p = jnp.zeros((1, Np), jnp.float32).at[0, :cout].set(
        jnp.ones((cout,), jnp.float32))
    shift_p = jnp.zeros((1, Np), jnp.float32).at[0, :cout].set(b)
    return dict(kh=1, kw=1, cout=cout, K=K, Kp=Kp, Np=Np,
                w=w_p, scale=scale_p, shift=shift_p)


def prepare_inference_params(raw):
    """One-time hoisted weight prep: BN fold, reshape, pad, bf16 cast."""
    p = {"conv1": _prep_conv(raw["conv1"], raw["bn1"])}
    stages = []
    for stage in raw["layers"]:
        blocks = []
        for blk in stage:
            nb = {
                "conv1": _prep_conv(blk["conv1"], blk["bn1"]),
                "conv2": _prep_conv(blk["conv2"], blk["bn2"]),
                "conv3": _prep_conv(blk["conv3"], blk["bn3"]),
                "stride": blk["stride"],
                "downsample": None,
            }
            if blk["downsample"] is not None:
                dw, dbn = blk["downsample"]
                nb["downsample"] = _prep_conv(dw, dbn)
            blocks.append(nb)
        stages.append(blocks)
    p["layers"] = stages
    p["fc"] = _prep_fc(raw["fc_w"], raw["fc_b"])
    return p


# --------------------------------------------------------------------------
# Full forward pass (Net.forward == resnet50 forward with 100-class fc)
# --------------------------------------------------------------------------
def net_forward(params, x_nchw):
    x = jnp.transpose(x_nchw, (0, 2, 3, 1)).astype(jnp.float32)  # -> NHWC
    x = conv_bn(x, params["conv1"], stride=2, pad=3, relu=True)
    x = maxpool_3x3_s2(x)
    for stage in params["layers"]:
        for blk in stage:
            x = bottleneck(x, blk)
    pooled = global_avgpool(x)                        # (N, 2048)
    logits = matmul_bn(pooled, params["fc"], relu=False)
    return logits                                     # (N, num_class)


if __name__ == "__main__":
    key = jax.random.PRNGKey(0)
    k_param, k_x = jax.random.split(key)
    raw_params = make_resnet50_params(k_param, NUM_CLASS)
    params = prepare_inference_params(raw_params)
    # Small ResNet-compatible input, PyTorch NCHW convention.
    x = jax.random.normal(k_x, (2, 3, 32, 32), jnp.float32)
    # TODO(synk): BatchNorm is implemented in inference mode (folded running
    # stats); training-mode batch statistics are not reproduced.
    logits = net_forward(params, x)
    logits = jax.block_until_ready(logits)
    assert logits.shape == (2, NUM_CLASS)
    assert bool(jnp.all(jnp.isfinite(logits)))
    print("KERNEL_OK")
</pallas_src>

<mosaic_0001>
module attributes {stable_mosaic.version = 11 : i64} {
  func.func @_matmul_bn_kernel(%arg0: i32, %arg1: i32, %arg2: memref<256x160xbf16, #tpu.memory_space<vmem>>, %arg3: memref<160x128xbf16, #tpu.memory_space<vmem>>, %arg4: memref<1x128xf32, #tpu.memory_space<vmem>>, %arg5: memref<1x128xf32, #tpu.memory_space<vmem>>, %arg6: memref<256x128xf32, #tpu.memory_space<vmem>>) attributes {dimension_semantics = [#tpu.dimension_semantics<parallel>, #tpu.dimension_semantics<parallel>], iteration_bounds = array<i64: 2, 1>, scalar_prefetch = 0 : i64, scratch_operands = 0 : i64, tpu.core_type = #tpu.core_type<tc>, window_params = [{transform_indices = @transform_0, window_bounds = array<i64: 256, 160>}, {transform_indices = @transform_1, window_bounds = array<i64: 160, 128>}, {transform_indices = @transform_2, window_bounds = array<i64: 1, 128>}, {transform_indices = @transform_3, window_bounds = array<i64: 1, 128>}, {transform_indices = @transform_4, window_bounds = array<i64: 256, 128>}]} {
    %c0 = arith.constant 0 : index
    %c0_0 = arith.constant 0 : index
    %0 = vector.load %arg2[%c0, %c0_0] : memref<256x160xbf16, #tpu.memory_space<vmem>>, vector<256x160xbf16>
    %c0_1 = arith.constant 0 : index
    %c0_2 = arith.constant 0 : index
    %1 = vector.load %arg3[%c0_1, %c0_2] : memref<160x128xbf16, #tpu.memory_space<vmem>>, vector<160x128xbf16>
    %cst = arith.constant dense<0.000000e+00> : vector<256x128xf32>
    %2 = tpu.matmul %0, %1, %cst {dimension_numbers = #tpu.dot_dimension_numbers<[1], [0], [0], [1], [0, 0, 1, 1], [], []>} : vector<256x160xbf16>, vector<160x128xbf16>, vector<256x128xf32> -> vector<256x128xf32>
    %c0_3 = arith.constant 0 : index
    %c0_4 = arith.constant 0 : index
    %3 = vector.load %arg4[%c0_3, %c0_4] : memref<1x128xf32, #tpu.memory_space<vmem>>, vector<1x128xf32>
    %4 = vector.broadcast %3 : vector<1x128xf32> to vector<256x128xf32>
    %5 = arith.mulf %2, %4 : vector<256x128xf32>
    %c0_5 = arith.constant 0 : index
    %c0_6 = arith.constant 0 : index
    %6 = vector.load %arg5[%c0_5, %c0_6] : memref<1x128xf32, #tpu.memory_space<vmem>>, vector<1x128xf32>
    %7 = vector.broadcast %6 : vector<1x128xf32> to vector<256x128xf32>
    %8 = arith.addf %5, %7 : vector<256x128xf32>
    %cst_7 = arith.constant 0.000000e+00 : f32
    %9 = vector.broadcast %cst_7 : f32 to vector<256x128xf32>
    %10 = arith.maximumf %8, %9 : vector<256x128xf32>
    %c0_8 = arith.constant 0 : index
    %c0_9 = arith.constant 0 : index
    %11 = vector.load %arg6[%c0_8, %c0_9] : memref<256x128xf32, #tpu.memory_space<vmem>>, vector<256x128xf32>
    tpu.vector_store %arg6[%c0_8, %c0_9], %10 {strides = array<i32>} : memref<256x128xf32, #tpu.memory_space<vmem>>, vector<256x128xf32>,
    return
  }
  func.func @transform_0(%arg0: i32, %arg1: i32) -> (i32, i32) {
    %c0_i32 = arith.constant 0 : i32
    %c0_i32_0 = arith.constant 0 : i32
    return %arg0, %c0_i32 : i32, i32
  }
  func.func @transform_1(%arg0: i32, %arg1: i32) -> (i32, i32) {
    %c0_i32 = arith.constant 0 : i32
    %c0_i32_0 = arith.constant 0 : i32
    return %c0_i32, %arg1 : i32, i32
  }
  func.func @transform_2(%arg0: i32, %arg1: i32) -> (i32, i32) {
    %c0_i32 = arith.constant 0 : i32
    %c0_i32_0 = arith.constant 0 : i32
    return %c0_i32, %arg1 : i32, i32
  }
  func.func @transform_3(%arg0: i32, %arg1: i32) -> (i32, i32) {
    %c0_i32 = arith.constant 0 : i32
    %c0_i32_0 = arith.constant 0 : i32
    return %c0_i32, %arg1 : i32, i32
  }
  func.func @transform_4(%arg0: i32, %arg1: i32) -> (i32, i32) {
    %c0_i32 = arith.constant 0 : i32
    return %arg0, %arg1 : i32, i32
  }
}

</mosaic_0001>

<bundles_post_ra>
// kernel: tpu_custom_call.1
= control target key start
LH: loop header
LB: loop body
LE: loop exit
PB: predicated region body
PF: predicated region fallthrough
CT: control target
= control target key end

     0   :  { %9 = vsyncpa [#allocation3], 0  ;;  %s1627_s0 = inlined_call_operand.vmem [shape: bf16[512,160], index: 0, kind: input, shape index: {}]   ;;  %s1628_s1 = inlined_call_operand.vmem [shape: bf16[160,128], index: 1, kind: input, shape index: {}]   ;;  %s1629_s2 = inlined_call_operand.vmem [shape: f32[1,128], index: 2, kind: input, shape index: {}]   ;;  %s1630_s3 = inlined_call_operand.vmem [shape: f32[1,128], index: 3, kind: input, shape index: {}]   ;;  %s1631_s4 = inlined_call_operand.hbm [shape: f32[512,128], index: 4, kind: output, shape index: {}]  }
   0x1   :  { %11 = vsyncpa [#allocation3 + $0x1], 0  ;;  %s1320_s15 = smov 0   ;;  %s1322_s16 = smov 0  }
   0x2   :  { %s1324_s17 = smov 0   ;;  %s1326_s18 = smov 0  }
   0x3   :  { %s1328_s19 = smov 0   ;;  %s1330_s20 = smov 0  }
   0x4 LB: > { %s996_s21 = sadd.s32 4294967295, %s1289_s20   ;;  %s997_s22 = sadd.s32 4294967294, %s1289_s20   ;;  %s1289_s20 = sphi %s1330_s20, %s17_s20   ;;  %s1285_s19 = sphi %s1328_s19, %s1638_s19   ;;  %s1281_s18 = sphi %s1326_s18, %s1637_s18   ;;  %s1277_s17 = sphi %s1324_s17, %s1636_s17   ;;  %s1273_s16 = sphi %s1322_s16, %s1635_s16   ;;  %s1269_s15 = sphi %s1320_s15, %s1634_s15  }
   0x5   : > { %s29_s23 = sadd.s32 1, %s1285_s19  ;;  %s142_s24 = sadd.s32 1, %s1277_s17 }
   0x6   : > { %p31_p0 = scmp.ge.s32.totalorder %s29_s23, 2  ;;  %p152_p1 = scmp.ne.s32.totalorder %s1277_s17, %s1273_s16 }
   0x7   : > { %p153_p2 = scmp.eq.s32.totalorder %s996_s21, 1  ;;  %p158_p3 = scmp.ne.s32.totalorder %s1273_s16, %s1269_s15 }
   0x8   : > { %s1640_s23 = smov (%p31_p0, %s29_s23), 0  ;;  %p159_p5 = scmp.eq.s32.totalorder %s997_s22, 1 }
   0x9   : > { %p1360_p4 = por %p153_p2, %p152_p1  ;;  %s137_s26 = ssub.s32 %s1285_s19, %s1640_s23 }
   0xa   : > { %p1003_p6 = scmp.ge.s32.totalorder %s1289_s20, 1  ;;  %p140_p7 = scmp.eq.s32.totalorder %s137_s26, 0 }
   0xb   : > { %p1367_p8 = por %p159_p5, %p158_p3  ;;  %p206_p9 = scmp.lt.s32.totalorder %s1289_s20, 3 }
   0xc   : > { %s1373_s28 = scalar_select %p140_p7, %s1277_s17, %s142_s24  }
   0xd   : > { %p207_p10 = pnand %p1003_p6, %p206_p9 }
   0xe   : > { %v1153_v0 = vld [vmem:[%s1628_s1] sm:$0xff] (!%p207_p10)   ;;  %v1291_v1 = vmov (!%p207_p10), 0   ;;  %s1005_s5 = sshll.u32 (!%p207_p10), %s1281_s18, 5  ;;  %v1154_v2 = vld [vmem:[%s1628_s1 + $0x8] sm:$0xff] (!%p207_p10)   ;;  %v1155_v3 = vld [vmem:[%s1628_s1 + $0x10] sm:$0xff] (!%p207_p10)   ;;  %vm518_vm0 = vcmask (!%p207_p10), 261120  }
   0xf   : > { %210 = sbr.rel (%p207_p10) target bundleno = 346 (0x15a), region = 36  ;;  %567 = vmatprep.subr.bf16.mxu0 (!%p207_p10), %v1291_v1  ;;  %1075 = vmatprep.subr.bf16.mxu1 (!%p207_p10), %v1291_v1  ;;  %p244_p11 = scmp.lt.s32.totalorder (!%p207_p10), %s1005_s5, 63  ;;  %v1156_v4 = vld [vmem:[%s1628_s1 + $0x18] sm:$0xff] (!%p207_p10)   ;;  %v1157_v7 = vld [vmem:[%s1628_s1 + $0x20] sm:$0xff] (!%p207_p10)   ;;  %v1158_v8 = vld [vmem:[%s1628_s1 + $0x28] sm:$0xff] (!%p207_p10)  }
  0x10   : > { %568 = vmatpush1.bf16.msra.mxu0 (!%p207_p10), %v1153_v0  ;;  %1085 = vmatpush1.bf16.msra.mxu1 (!%p207_p10), %v1153_v0  ;;  %v1159_v9 = vld [vmem:[%s1628_s1 + $0x30] sm:$0xff] (!%p207_p10)   ;;  %v1160_v10 = vld [vmem:[%s1628_s1 + $0x38] sm:$0xff] (!%p207_p10)   ;;  %v1161_v11 = vld [vmem:[%s1628_s1 + $0x40] sm:$0xff] (!%p207_p10)   ;;  %s240_s12 = sand.u32 (!%p207_p10), 1, %s1273_s16   ;;  %s1074_s29 = sshll.u32 (!%p207_p10), %s1281_s18, 12 }
  0x11   : > { %569 = vmatprep.subr.bf16.mxu0 (!%p207_p10), %v1291_v1  ;;  %1076 = vmatprep.subr.bf16.mxu1 (!%p207_p10), %v1291_v1  ;;  %v1162_v12 = vld [vmem:[%s1628_s1 + $0x48] sm:$0xff] (!%p207_p10)   ;;  %v1463_v43 = vld [vmem:[%s1629_s2] ss:$0 sm:$0xff] (!%p207_p10)  ;;  %s1004_s26 = sshll.u32 (!%p207_p10), %s240_s12, 8  ;;  %s1571_s7 = scalar_lea.hbm (!%p207_p10), %s1631_s4, %s1074_s29 }
  0x12   : > { %v1468_v45 = vld [vmem:[%s1630_s3] ss:$0 sm:$0xff] (!%p207_p10)  ;;  %s1581_s18 = scalar_lea.sflag (!%p207_p10), [#allocation3], %s240_s12  ;;  %s1292_s9 = smov (!%p207_p10), [#allocation2]  }
  0x14   : > { %570 = vmatpush1.bf16.msra.mxu0 (!%p207_p10), %v1154_v2  ;;  %1086 = vmatpush1.bf16.msra.mxu1 (!%p207_p10), %v1154_v2 }
  0x15   : > { %571 = vmatprep.subr.bf16.mxu0 (!%p207_p10), %v1291_v1  ;;  %1077 = vmatprep.subr.bf16.mxu1 (!%p207_p10), %v1291_v1 }
  0x16   : > { %s1642_s5 = smov (!%p244_p11, %s1005_s5), 63 }
  0x17   : > { %s1073_s10 = sshll.u32 %s1642_s5, 3 }
  0x18   : > { %s1388_s13 = scalar_lea.vmem %s1627_s0, %s1073_s10  ;;  %572 = vmatpush1.bf16.msra.mxu0 %v1155_v3  ;;  %1087 = vmatpush1.bf16.msra.mxu1 %v1155_v3  ;;  %s1215_s10 = sshll.u32 %s1292_s9, 4  ;;  %s1216_s10 = int_to_ptr.vmem [resolvable:$false] %s1215_s10 }
  0x19   : > { %573 = vmatprep.subr.bf16.mxu0 %v1291_v1  ;;  %1078 = vmatprep.subr.bf16.mxu1 %v1291_v1  ;;  %v1165_v5 = vld [vmem:[%s1388_s13 + $0x4] ss:$8 sps:$4 sm:$0xff]   ;;  %v1163_v13 = vld [vmem:[%s1388_s13] ss:$8 sps:$4 sm:$0xff]   ;;  %v1169_v15 = vld [vmem:[%s1388_s13 + $0x14] ss:$8 sps:$4 sm:$0xff]  }
  0x1a   : > { %v1168_v6 = vld [vmem:[%s1388_s13 + $0x84] ss:$8 sps:$4 sm:$0xff]   ;;  %1050 = vmatprep.mubr.msk.bf16.mxu0 %vm518_vm0, %v1165_v5  ;;  %v1166_v14 = vld [vmem:[%s1388_s13 + $0x80] ss:$8 sps:$4 sm:$0xff]   ;;  %v1171_v16 = vld [vmem:[%s1388_s13 + $0x94] ss:$8 sps:$4 sm:$0xff]  }
  0x1b   : > { %1058 = vmatprep.mubr.msk.bf16.mxu1 %vm518_vm0, %v1168_v6  ;;  %v1173_v17 = vld [vmem:[%s1388_s13 + $0x10] ss:$8 sps:$4 sm:$0xff]   ;;  %v1175_v19 = vld [vmem:[%s1388_s13 + $0x24] ss:$8 sps:$4 sm:$0xff]   ;;  %v1179_v21 = vld [vmem:[%s1388_s13 + $0x20] ss:$8 sps:$4 sm:$0xff]  }
  0x1c   : > { %574 = vmatpush1.bf16.msra.mxu0 %v1156_v4  ;;  %1088 = vmatpush1.bf16.msra.mxu1 %v1156_v4  ;;  %v1174_v18 = vld [vmem:[%s1388_s13 + $0x90] ss:$8 sps:$4 sm:$0xff]   ;;  %v1177_v20 = vld [vmem:[%s1388_s13 + $0xa4] ss:$8 sps:$4 sm:$0xff]   ;;  %v1180_v22 = vld [vmem:[%s1388_s13 + $0xa0] ss:$8 sps:$4 sm:$0xff]  }
  0x1d   : > { %575 = vmatprep.subr.bf16.mxu0 %v1291_v1  ;;  %1079 = vmatprep.subr.bf16.mxu1 %v1291_v1  ;;  %v1181_v23 = vld [vmem:[%s1388_s13 + $0x34] ss:$8 sps:$4 sm:$0xff]   ;;  %v1185_v25 = vld [vmem:[%s1388_s13 + $0x30] ss:$8 sps:$4 sm:$0xff]   ;;  %v1187_v27 = vld [vmem:[%s1388_s13 + $0x44] ss:$8 sps:$4 sm:$0xff]  }
  0x1e   : > { %v1183_v24 = vld [vmem:[%s1388_s13 + $0xb4] ss:$8 sps:$4 sm:$0xff]   ;;  %v1186_v26 = vld [vmem:[%s1388_s13 + $0xb0] ss:$8 sps:$4 sm:$0xff]   ;;  %v1189_v28 = vld [vmem:[%s1388_s13 + $0xc4] ss:$8 sps:$4 sm:$0xff]  }
  0x1f   : > { %v1191_v29 = vld [vmem:[%s1388_s13 + $0x40] ss:$8 sps:$4 sm:$0xff]   ;;  %v1193_v31 = vld [vmem:[%s1388_s13 + $0x54] ss:$8 sps:$4 sm:$0xff]   ;;  %v1197_v33 = vld [vmem:[%s1388_s13 + $0x50] ss:$8 sps:$4 sm:$0xff]  }
  0x20   : > { %576 = vmatpush1.bf16.msra.mxu0 %v1157_v7  ;;  %1089 = vmatpush1.bf16.msra.mxu1 %v1157_v7  ;;  %v1192_v30 = vld [vmem:[%s1388_s13 + $0xc0] ss:$8 sps:$4 sm:$0xff]   ;;  %v1195_v32 = vld [vmem:[%s1388_s13 + $0xd4] ss:$8 sps:$4 sm:$0xff]   ;;  %v1198_v34 = vld [vmem:[%s1388_s13 + $0xd0] ss:$8 sps:$4 sm:$0xff]  }
  0x21   : > { %577 = vmatprep.subr.bf16.mxu0 %v1291_v1  ;;  %1080 = vmatprep.subr.bf16.mxu1 %v1291_v1  ;;  %v1199_v35 = vld [vmem:[%s1388_s13 + $0x64] ss:$8 sps:$4 sm:$0xff]   ;;  %v1203_v37 = vld [vmem:[%s1388_s13 + $0x60] ss:$8 sps:$4 sm:$0xff]   ;;  %v1205_v39 = vld [vmem:[%s1388_s13 + $0x74] ss:$8 sps:$4 sm:$0xff]  }
  0x22   : > { %v1201_v36 = vld [vmem:[%s1388_s13 + $0xe4] ss:$8 sps:$4 sm:$0xff]   ;;  %v1204_v38 = vld [vmem:[%s1388_s13 + $0xe0] ss:$8 sps:$4 sm:$0xff]   ;;  %v1207_v40 = vld [vmem:[%s1388_s13 + $0xf4] ss:$8 sps:$4 sm:$0xff]  }
  0x23   : > { %v1209_v41 = vld [vmem:[%s1388_s13 + $0x70] ss:$8 sps:$4 sm:$0xff]   ;;  %s1217_s11 = scalar_lea.vmem %s1216_s10, 8192 }
  0x24   : > { %578 = vmatpush1.bf16.msra.mxu0 %v1158_v8  ;;  %1090 = vmatpush1.bf16.msra.mxu1 %v1158_v8  ;;  %v1210_v42 = vld [vmem:[%s1388_s13 + $0xf0] ss:$8 sps:$4 sm:$0xff]   ;;  %s1480_s13 = scalar_lea.vmem [#allocation2], %s1004_s26 }
  0x25   : > { %579 = vmatprep.subr.bf16.mxu0 %v1291_v1  ;;  %1081 = vmatprep.subr.bf16.mxu1 %v1291_v1  ;;  %s885_s30 = sshll.u32 %s1480_s13, 4  ;;  %s1573_s30 = int_to_ptr.vmem [resolvable:$true] %s885_s30 }
  0x26   : > { %s1211_s8 = scalar_lea.vmem %s1573_s30, 4096  ;;  %p1218_p1 = scmp.lt.s32.totalorder %s1573_s30, %s1216_s10 }
  0x27   : > { %p1212_p12 = scmp.ne.s32.totalorder %s1573_s30, %s1211_s8  ;;  %p1219_p2 = scmp.lt.s32.totalorder %s1217_s11, %s1211_s8 }
  0x28   : > { %580 = vmatpush1.bf16.msra.mxu0 %v1159_v9  ;;  %1091 = vmatpush1.bf16.msra.mxu1 %v1159_v9 }
  0x29   : > { %581 = vmatprep.subr.bf16.mxu0 %v1291_v1  ;;  %1082 = vmatprep.subr.bf16.mxu1 %v1291_v1  ;;  %p1213_p13 = pnand %p1212_p12, %p1360_p4  ;;  %p1220_p3 = por %p1219_p2, %p1218_p1 }
  0x2b   : > { %p1214_p0 = pneg %p1213_p13 }
  0x2c   : > { %582 = vmatpush1.bf16.msra.mxu0 %v1160_v10  ;;  %1092 = vmatpush1.bf16.msra.mxu1 %v1160_v10 }
  0x2d   : > { %583 = vmatprep.subr.bf16.mxu0 %v1291_v1  ;;  %1083 = vmatprep.subr.bf16.mxu1 %v1291_v1  ;;  %p1221_p5 = pnand %p1220_p3, %p1214_p0 }
  0x30   : > { %584 = vmatpush1.bf16.msra.mxu0 %v1161_v11  ;;  %1093 = vmatpush1.bf16.msra.mxu1 %v1161_v11 }
  0x31   : > { %585 = vmatprep.subr.bf16.mxu0 %v1291_v1  ;;  %1084 = vmatprep.subr.bf16.mxu1 %v1291_v1 }
  0x34   : > { %586 = vmatpush1.bf16.msra.mxu0 %v1162_v12  ;;  %1094 = vmatpush1.bf16.msra.mxu1 %v1162_v12 }
  0x37   : > { %600 = vmatmul.mubr.bf16.vlgmr.msra.gmra.mrb[0].mxu0 %v1163_v13  ;;  %664 = vmatmul.mubr.bf16.vlgmr.msra.gmra.mrb[0].mxu1 %v1166_v14 }
  0x38   : > { %1051 = vmatprep.mubr.msk.bf16.mxu0 %vm518_vm0, %v1169_v15  ;;  %1059 = vmatprep.mubr.msk.bf16.mxu1 %vm518_vm0, %v1171_v16 }
  0x3f   : > { %608 = vmatmul.mubr.bf16.gmra.mrb[4].mxu0 %v1173_v17  ;;  %672 = vmatmul.mubr.bf16.gmra.mrb[4].mxu1 %v1174_v18 }
  0x40   : > { %1052 = vmatprep.mubr.msk.bf16.mxu0 %vm518_vm0, %v1175_v19  ;;  %1060 = vmatprep.mubr.msk.bf16.mxu1 %vm518_vm0, %v1177_v20 }
  0x47   : > { %616 = vmatmul.mubr.bf16.gmra.mrb[8].mxu0 %v1179_v21  ;;  %680 = vmatmul.mubr.bf16.gmra.mrb[8].mxu1 %v1180_v22 }
  0x48   : > { %1053 = vmatprep.mubr.msk.bf16.mxu0 %vm518_vm0, %v1181_v23  ;;  %1061 = vmatprep.mubr.msk.bf16.mxu1 %vm518_vm0, %v1183_v24 }
  0x4f   : > { %624 = vmatmul.mubr.bf16.gmra.mrb[12].mxu0 %v1185_v25  ;;  %688 = vmatmul.mubr.bf16.gmra.mrb[12].mxu1 %v1186_v26 }
  0x50   : > { %1054 = vmatprep.mubr.msk.bf16.mxu0 %vm518_vm0, %v1187_v27  ;;  %1062 = vmatprep.mubr.msk.bf16.mxu1 %vm518_vm0, %v1189_v28 }
  0x57   : > { %632 = vmatmul.mubr.bf16.gmra.mrb[16].mxu0 %v1191_v29  ;;  %696 = vmatmul.mubr.bf16.gmra.mrb[16].mxu1 %v1192_v30 }
  0x58   : > { %1055 = vmatprep.mubr.msk.bf16.mxu0 %vm518_vm0, %v1193_v31  ;;  %1063 = vmatprep.mubr.msk.bf16.mxu1 %vm518_vm0, %v1195_v32 }
  0x5f   : > { %640 = vmatmul.mubr.bf16.gmra.mrb[20].mxu0 %v1197_v33  ;;  %704 = vmatmul.mubr.bf16.gmra.mrb[20].mxu1 %v1198_v34 }
  0x60   : > { %1056 = vmatprep.mubr.msk.bf16.mxu0 %vm518_vm0, %v1199_v35  ;;  %1064 = vmatprep.mubr.msk.bf16.mxu1 %vm518_vm0, %v1201_v36 }
  0x67   : > { %648 = vmatmul.mubr.bf16.gmra.mrb[24].mxu0 %v1203_v37  ;;  %712 = vmatmul.mubr.bf16.gmra.mrb[24].mxu1 %v1204_v38 }
  0x68   : > { %1057 = vmatprep.mubr.msk.bf16.mxu0 %vm518_vm0, %v1205_v39  ;;  %1065 = vmatprep.mubr.msk.bf16.mxu1 %vm518_vm0, %v1207_v40 }
  0x6f   : > { %656 = vmatmul.mubr.bf16.gmra.mrb[28].mxu0 %v1209_v41  ;;  %720 = vmatmul.mubr.bf16.gmra.mrb[28].mxu1 %v1210_v42 }
 0x10a   : > { %v601_v44 = vpop.f32.mrb[0].mxu0  ;;  %v665_v46 = vpop.f32.mrb[0].mxu1 }
 0x10b   : > { %v735_v47 = vmul.f32 %v1463_v43, %v601_v44  ;;  %v751_v48 = vmul.f32 %v1463_v43, %v665_v46  ;;  %v603_v49 = vpop.f32.mrb[1].mxu0  ;;  %v667_v50 = vpop.f32.mrb[1].mxu1 }
 0x10c   : > { %v604_v51 = vpop.f32.mrb[2].mxu0  ;;  %v668_v52 = vpop.f32.mrb[2].mxu1 }
 0x10d   : > { %v774_v53 = vadd.f32 %v1468_v45, %v735_v47  ;;  %v790_v54 = vadd.f32 %v1468_v45, %v751_v48  ;;  %v736_v55 = vmul.f32 %v1463_v43, %v604_v51  ;;  %v752_v56 = vmul.f32 %v1463_v43, %v668_v52  ;;  %v606_v57 = vpop.f32.mrb[3].mxu0  ;;  %v670_v58 = vpop.f32.mrb[3].mxu1 }
 0x10f   : > { %v806_v59 = vmax.f32 %v774_v53, 0.0  ;;  %v822_v60 = vmax.f32 %v790_v54, 0.0  ;;  %v775_v61 = vadd.f32 %v1468_v45, %v736_v55  ;;  %v791_v62 = vadd.f32 %v1468_v45, %v752_v56 }
 0x111   : > { %838 = vst [vmem:[%s1480_s13] sm:$0xff] %v806_v59  ;;  %854 = vst [vmem:[%s1480_s13 + $0x80] sm:$0xff] %v822_v60  ;;  %v807_v63 = vmax.f32 %v775_v61, 0.0  ;;  %v823_v0 = vmax.f32 %v791_v62, 0.0 }
 0x112   : > { %v609_v1 = vpop.f32.mrb[4].mxu0  ;;  %v673_v2 = vpop.f32.mrb[4].mxu1 }
 0x113   : > { %839 = vst [vmem:[%s1480_s13 + $0x8] sm:$0xff] %v807_v63  ;;  %855 = vst [vmem:[%s1480_s13 + $0x88] sm:$0xff] %v823_v0  ;;  %v737_v3 = vmul.f32 %v1463_v43, %v609_v1  ;;  %v753_v4 = vmul.f32 %v1463_v43, %v673_v2  ;;  %v611_v5 = vpop.f32.mrb[5].mxu0  ;;  %v675_v6 = vpop.f32.mrb[5].mxu1 }
 0x114   : > { %v612_v7 = vpop.f32.mrb[6].mxu0  ;;  %v676_v8 = vpop.f32.mrb[6].mxu1 }
 0x115   : > { %v776_v9 = vadd.f32 %v1468_v45, %v737_v3  ;;  %v792_v10 = vadd.f32 %v1468_v45, %v753_v4  ;;  %v738_v11 = vmul.f32 %v1463_v43, %v612_v7  ;;  %v754_v12 = vmul.f32 %v1463_v43, %v676_v8  ;;  %v614_v13 = vpop.f32.mrb[7].mxu0  ;;  %v678_v14 = vpop.f32.mrb[7].mxu1 }
 0x117   : > { %v808_v15 = vmax.f32 %v776_v9, 0.0  ;;  %v824_v16 = vmax.f32 %v792_v10, 0.0  ;;  %v777_v17 = vadd.f32 %v1468_v45, %v738_v11  ;;  %v793_v18 = vadd.f32 %v1468_v45, %v754_v12 }
 0x119   : > { %840 = vst [vmem:[%s1480_s13 + $0x10] sm:$0xff] %v808_v15  ;;  %856 = vst [vmem:[%s1480_s13 + $0x90] sm:$0xff] %v824_v16  ;;  %v809_v19 = vmax.f32 %v777_v17, 0.0  ;;  %v825_v20 = vmax.f32 %v793_v18, 0.0 }
 0x11a   : > { %v617_v21 = vpop.f32.mrb[8].mxu0  ;;  %v681_v22 = vpop.f32.mrb[8].mxu1 }
 0x11b   : > { %841 = vst [vmem:[%s1480_s13 + $0x18] sm:$0xff] %v809_v19  ;;  %857 = vst [vmem:[%s1480_s13 + $0x98] sm:$0xff] %v825_v20  ;;  %v739_v23 = vmul.f32 %v1463_v43, %v617_v21  ;;  %v755_v24 = vmul.f32 %v1463_v43, %v681_v22  ;;  %v619_v25 = vpop.f32.mrb[9].mxu0  ;;  %v683_v26 = vpop.f32.mrb[9].mxu1 }
 0x11c   : > { %v620_v27 = vpop.f32.mrb[10].mxu0  ;;  %v684_v28 = vpop.f32.mrb[10].mxu1 }
 0x11d   : > { %v778_v29 = vadd.f32 %v1468_v45, %v739_v23  ;;  %v794_v30 = vadd.f32 %v1468_v45, %v755_v24  ;;  %v740_v31 = vmul.f32 %v1463_v43, %v620_v27  ;;  %v756_v32 = vmul.f32 %v1463_v43, %v684_v28  ;;  %v622_v33 = vpop.f32.mrb[11].mxu0  ;;  %v686_v34 = vpop.f32.mrb[11].mxu1 }
 0x11f   : > { %v810_v35 = vmax.f32 %v778_v29, 0.0  ;;  %v826_v36 = vmax.f32 %v794_v30, 0.0  ;;  %v779_v37 = vadd.f32 %v1468_v45, %v740_v31  ;;  %v795_v38 = vadd.f32 %v1468_v45, %v756_v32 }
 0x121   : > { %842 = vst [vmem:[%s1480_s13 + $0x20] sm:$0xff] %v810_v35  ;;  %858 = vst [vmem:[%s1480_s13 + $0xa0] sm:$0xff] %v826_v36  ;;  %v811_v39 = vmax.f32 %v779_v37, 0.0  ;;  %v827_v40 = vmax.f32 %v795_v38, 0.0 }
 0x122   : > { %v625_v41 = vpop.f32.mrb[12].mxu0  ;;  %v689_v42 = vpop.f32.mrb[12].mxu1 }
 0x123   : > { %843 = vst [vmem:[%s1480_s13 + $0x28] sm:$0xff] %v811_v39  ;;  %859 = vst [vmem:[%s1480_s13 + $0xa8] sm:$0xff] %v827_v40  ;;  %v741_v44 = vmul.f32 %v1463_v43, %v625_v41  ;;  %v757_v46 = vmul.f32 %v1463_v43, %v689_v42  ;;  %v627_v47 = vpop.f32.mrb[13].mxu0  ;;  %v691_v48 = vpop.f32.mrb[13].mxu1 }
 0x124   : > { %v628_v49 = vpop.f32.mrb[14].mxu0  ;;  %v692_v50 = vpop.f32.mrb[14].mxu1 }
 0x125   : > { %v780_v51 = vadd.f32 %v1468_v45, %v741_v44  ;;  %v796_v52 = vadd.f32 %v1468_v45, %v757_v46  ;;  %v742_v53 = vmul.f32 %v1463_v43, %v628_v49  ;;  %v758_v54 = vmul.f32 %v1463_v43, %v692_v50  ;;  %v630_v55 = vpop.f32.mrb[15].mxu0  ;;  %v694_v56 = vpop.f32.mrb[15].mxu1 }
 0x127   : > { %v812_v57 = vmax.f32 %v780_v51, 0.0  ;;  %v828_v58 = vmax.f32 %v796_v52, 0.0  ;;  %v781_v59 = vadd.f32 %v1468_v45, %v742_v53  ;;  %v797_v60 = vadd.f32 %v1468_v45, %v758_v54 }
 0x129   : > { %844 = vst [vmem:[%s1480_s13 + $0x30] sm:$0xff] %v812_v57  ;;  %860 = vst [vmem:[%s1480_s13 + $0xb0] sm:$0xff] %v828_v58  ;;  %v813_v61 = vmax.f32 %v781_v59, 0.0  ;;  %v829_v62 = vmax.f32 %v797_v60, 0.0 }
 0x12a   : > { %v633_v63 = vpop.f32.mrb[16].mxu0  ;;  %v697_v0 = vpop.f32.mrb[16].mxu1 }
 0x12b   : > { %845 = vst [vmem:[%s1480_s13 + $0x38] sm:$0xff] %v813_v61  ;;  %861 = vst [vmem:[%s1480_s13 + $0xb8] sm:$0xff] %v829_v62  ;;  %v743_v1 = vmul.f32 %v1463_v43, %v633_v63  ;;  %v759_v2 = vmul.f32 %v1463_v43, %v697_v0  ;;  %v635_v3 = vpop.f32.mrb[17].mxu0  ;;  %v699_v4 = vpop.f32.mrb[17].mxu1 }
 0x12c   : > { %v636_v5 = vpop.f32.mrb[18].mxu0  ;;  %v700_v6 = vpop.f32.mrb[18].mxu1 }
 0x12d   : > { %v782_v7 = vadd.f32 %v1468_v45, %v743_v1  ;;  %v798_v8 = vadd.f32 %v1468_v45, %v759_v2  ;;  %v744_v9 = vmul.f32 %v1463_v43, %v636_v5  ;;  %v760_v10 = vmul.f32 %v1463_v43, %v700_v6  ;;  %v638_v11 = vpop.f32.mrb[19].mxu0  ;;  %v702_v12 = vpop.f32.mrb[19].mxu1 }
 0x12f   : > { %v814_v13 = vmax.f32 %v782_v7, 0.0  ;;  %v830_v14 = vmax.f32 %v798_v8, 0.0  ;;  %v783_v15 = vadd.f32 %v1468_v45, %v744_v9  ;;  %v799_v16 = vadd.f32 %v1468_v45, %v760_v10 }
 0x131   : > { %846 = vst [vmem:[%s1480_s13 + $0x40] sm:$0xff] %v814_v13  ;;  %862 = vst [vmem:[%s1480_s13 + $0xc0] sm:$0xff] %v830_v14  ;;  %v815_v17 = vmax.f32 %v783_v15, 0.0  ;;  %v831_v18 = vmax.f32 %v799_v16, 0.0 }
 0x132   : > { %v641_v19 = vpop.f32.mrb[20].mxu0  ;;  %v705_v20 = vpop.f32.mrb[20].mxu1 }
 0x133   : > { %847 = vst [vmem:[%s1480_s13 + $0x48] sm:$0xff] %v815_v17  ;;  %863 = vst [vmem:[%s1480_s13 + $0xc8] sm:$0xff] %v831_v18  ;;  %v745_v21 = vmul.f32 %v1463_v43, %v641_v19  ;;  %v761_v22 = vmul.f32 %v1463_v43, %v705_v20  ;;  %v643_v23 = vpop.f32.mrb[21].mxu0  ;;  %v707_v24 = vpop.f32.mrb[21].mxu1 }
 0x134   : > { %v644_v25 = vpop.f32.mrb[22].mxu0  ;;  %v708_v26 = vpop.f32.mrb[22].mxu1 }
 0x135   : > { %v784_v27 = vadd.f32 %v1468_v45, %v745_v21  ;;  %v800_v28 = vadd.f32 %v1468_v45, %v761_v22  ;;  %v746_v29 = vmul.f32 %v1463_v43, %v644_v25  ;;  %v762_v30 = vmul.f32 %v1463_v43, %v708_v26  ;;  %v646_v31 = vpop.f32.mrb[23].mxu0  ;;  %v710_v32 = vpop.f32.mrb[23].mxu1 }
 0x137   : > { %v816_v33 = vmax.f32 %v784_v27, 0.0  ;;  %v832_v34 = vmax.f32 %v800_v28, 0.0  ;;  %v785_v35 = vadd.f32 %v1468_v45, %v746_v29  ;;  %v801_v36 = vadd.f32 %v1468_v45, %v762_v30 }
 0x139   : > { %848 = vst [vmem:[%s1480_s13 + $0x50] sm:$0xff] %v816_v33  ;;  %864 = vst [vmem:[%s1480_s13 + $0xd0] sm:$0xff] %v832_v34  ;;  %v817_v37 = vmax.f32 %v785_v35, 0.0  ;;  %v833_v38 = vmax.f32 %v801_v36, 0.0 }
 0x13a   : > { %v649_v39 = vpop.f32.mrb[24].mxu0  ;;  %v713_v40 = vpop.f32.mrb[24].mxu1 }
 0x13b   : > { %849 = vst [vmem:[%s1480_s13 + $0x58] sm:$0xff] %v817_v37  ;;  %865 = vst [vmem:[%s1480_s13 + $0xd8] sm:$0xff] %v833_v38  ;;  %v747_v41 = vmul.f32 %v1463_v43, %v649_v39  ;;  %v763_v42 = vmul.f32 %v1463_v43, %v713_v40  ;;  %v651_v44 = vpop.f32.mrb[25].mxu0  ;;  %v715_v46 = vpop.f32.mrb[25].mxu1 }
 0x13c   : > { %v652_v47 = vpop.f32.mrb[26].mxu0  ;;  %v716_v48 = vpop.f32.mrb[26].mxu1 }
 0x13d   : > { %v786_v49 = vadd.f32 %v1468_v45, %v747_v41  ;;  %v802_v50 = vadd.f32 %v1468_v45, %v763_v42  ;;  %v748_v51 = vmul.f32 %v1463_v43, %v652_v47  ;;  %v764_v52 = vmul.f32 %v1463_v43, %v716_v48  ;;  %v654_v53 = vpop.f32.mrb[27].mxu0  ;;  %v718_v54 = vpop.f32.mrb[27].mxu1 }
 0x13f   : > { %v818_v55 = vmax.f32 %v786_v49, 0.0  ;;  %v834_v56 = vmax.f32 %v802_v50, 0.0  ;;  %v787_v57 = vadd.f32 %v1468_v45, %v748_v51  ;;  %v803_v58 = vadd.f32 %v1468_v45, %v764_v52 }
 0x141   : > { %850 = vst [vmem:[%s1480_s13 + $0x60] sm:$0xff] %v818_v55  ;;  %866 = vst [vmem:[%s1480_s13 + $0xe0] sm:$0xff] %v834_v56  ;;  %v819_v59 = vmax.f32 %v787_v57, 0.0  ;;  %v835_v60 = vmax.f32 %v803_v58, 0.0 }
 0x142   : > { %v657_v61 = vpop.f32.mrb[28].mxu0  ;;  %v721_v62 = vpop.f32.mrb[28].mxu1 }
 0x143   : > { %851 = vst [vmem:[%s1480_s13 + $0x68] sm:$0xff] %v819_v59  ;;  %867 = vst [vmem:[%s1480_s13 + $0xe8] sm:$0xff] %v835_v60  ;;  %v749_v63 = vmul.f32 %v1463_v43, %v657_v61  ;;  %v765_v0 = vmul.f32 %v1463_v43, %v721_v62  ;;  %v659_v1 = vpop.f32.mrb[29].mxu0  ;;  %v723_v2 = vpop.f32.mrb[29].mxu1 }
 0x144   : > { %v660_v3 = vpop.f32.mrb[30].mxu0  ;;  %v724_v4 = vpop.f32.mrb[30].mxu1 }
 0x145   : > { %v788_v5 = vadd.f32 %v1468_v45, %v749_v63  ;;  %v804_v6 = vadd.f32 %v1468_v45, %v765_v0  ;;  %v750_v7 = vmul.f32 %v1463_v43, %v660_v3  ;;  %v766_v8 = vmul.f32 %v1463_v43, %v724_v4  ;;  %v662_v9 = vpop.f32.mrb[31].mxu0  ;;  %v726_v10 = vpop.f32.mrb[31].mxu1 }
 0x147   : > { %v820_v11 = vmax.f32 %v788_v5, 0.0  ;;  %v836_v12 = vmax.f32 %v804_v6, 0.0  ;;  %v789_v13 = vadd.f32 %v1468_v45, %v750_v7  ;;  %v805_v14 = vadd.f32 %v1468_v45, %v766_v8 }
 0x149   : > { %852 = vst [vmem:[%s1480_s13 + $0x70] sm:$0xff] %v820_v11  ;;  %868 = vst [vmem:[%s1480_s13 + $0xf0] sm:$0xff] %v836_v12  ;;  %v821_v43 = vmax.f32 %v789_v13, 0.0  ;;  %v837_v15 = vmax.f32 %v805_v14, 0.0 }
 0x14b   : > { %853 = vst [vmem:[%s1480_s13 + $0x78] sm:$0xff] %v821_v43  ;;  %869 = vst [vmem:[%s1480_s13 + $0xf8] sm:$0xff] %v837_v15 }
 0x14c   : > { %1224 = shalt.err (!%p1221_p5)
}
 0x14d   : > { %s1225_s12 = scalar_lea.hbm %s1571_s7, 4096  ;;  %s1229_s22 = scalar_lea.hbm %s1631_s4, 8192 }
 0x14e   : > { %p1226_p6 = scmp.ne.s32.totalorder %s1571_s7, %s1225_s12  ;;  %p1230_p10 = scmp.lt.u32.totalorder %s1571_s7, %s1631_s4 }
 0x14f   : > { %p1231_p11 = scmp.lt.u32.totalorder %s1229_s22, %s1225_s12  ;;  %p1233_p13 = scmp.lt.u32.totalorder %s1225_s12, %s1571_s7 }
 0x150   : > { %p1227_p7 = pnand %p1226_p6, %p1360_p4 }
 0x151   : > { %p1232_p12 = por %p1231_p11, %p1230_p10 }
 0x152   : > { %p1228_p9 = pneg %p1227_p7 }
 0x153   : > { %p1234_p0 = por %p1233_p13, %p1232_p12 }
 0x155   : > { %p1235_p1 = pnand %p1234_p0, %p1228_p9 }
 0x157   : > { %1238 = shalt.err (!%p1235_p1)
}
 0x158   : > { %s1293_s13 = smov 128   ;;  %s1294_s29 = smov 8  }
 0x159   : > { %1095 = dma.vmem_to_hbm [thread:$0]  (%p1360_p4), %s1573_s30, 4096, %s1571_s7, %s1581_s18, %s1293_s13, %s1293_s13, %s1294_s29  }
 0x15a PF: > { %p1101_p2 = scmp.ge.s32.totalorder %s1289_s20, 2  ;;  %s900_s5 = sand.u32 1, %s1269_s15  }
 0x15b   : > { %s901_s6 = scalar_lea.sflag [#allocation3], %s900_s5 }
 0x15c   : > { %p1098_p3 = pnand %p1101_p2, %p1367_p8 }
 0x15e   : > { %1264 = dma.done.wait (!%p1098_p3), %s901_s6, 4096  }
 0x15f   : > { %1266 = vsyncadd (!%p1098_p3), %s901_s6, 4294963200  ;;  %s17_s20 = sadd.s32 1, %s1289_s20   ;;  %s1634_s15 = smov %s1273_s16 }
 0x160   : > { %p14_p5 = scmp.ge.s32.totalorder %s17_s20, 4   ;;  %s1635_s16 = smov %s1277_s17 }
 0x161   : > { %s1636_s17 = smov %s1373_s28  ;;  %s1637_s18 = smov %s1285_s19 }
 0x162   : > { %s1638_s19 = smov %s1640_s23  ;;  %16 = sbr.rel (!%p14_p5) target bundleno = 4 (0x4), region = 80 }
 0x169   :  { %906 = vsyncpa [#allocation3], 1 }
 0x16a   :  { %908 = vsyncpa [#allocation3 + $0x1], 1 }

</bundles_post_ra>
